<compile_context>
chip_gen: v7x
topology: tpu7x:2x2x1
jax: 0.10.0
libtpu: 0.0.40
codegen_flags: <defaults>
</compile_context>

<pallas_src>
import functools

import jax
import jax.numpy as jnp
from jax.experimental import pallas as pl
from jax.experimental.pallas import tpu as pltpu


def _scaler_kernel(w_ref, b_ref, x_ref, o_ref, *, c_in, c_out):
    # w_ref: SMEM (c_out, c_in)  temperature-folded 1x1-conv weights
    # b_ref: SMEM (c_out,)       temperature-folded bias
    # x_ref: VMEM (c_in, TL)     one batch element, one spatial tile (NCHW order)
    # o_ref: VMEM (c_out, TL)    temperature-scaled logits, same layout
    x = x_ref[...].astype(jnp.float32)          # (c_in, TL)
    rows = []
    for j in range(c_out):                      # fully unrolled: c_out*c_in FMAs
        acc = x[0:1, :] * w_ref[j, 0] + b_ref[j]
        for k in range(1, c_in):
            acc = acc + x[k:k + 1, :] * w_ref[j, k]
        rows.append(acc)
    o_ref[...] = jnp.concatenate(rows, axis=0).astype(o_ref.dtype)


@functools.partial(jax.jit, static_argnames=("tl_max",))
def scaler_forward(inputs_nchw, weight, bias, temperature, *, tl_max=4096):
    """inputs_nchw: (B, C_in, H, W) float32
       weight:      (C_in, C_out) float32   (synthetic 1x1-conv head)
       bias:        (C_out,) float32
       temperature: (1,) float32
       returns:     (B, C_out, H, W) float32  -- temperature-scaled logits
    """
    B, C_in, H, W = inputs_nchw.shape
    C_out = weight.shape[1]
    HW = H * W

    # NCHW -> (B, C_in, H*W): a pure reshape of contiguous memory (no copy).
    x = inputs_nchw.reshape(B, C_in, HW).astype(jnp.float32)

    # Fold 1/T into the tiny head parameters at trace time (free).
    inv_t = 1.0 / temperature.astype(jnp.float32)[0]
    w_folded = weight.astype(jnp.float32).T * inv_t        # (C_out, C_in)
    b_folded = bias.astype(jnp.float32) * inv_t            # (C_out,)

    # Lane-tile selection: large, multiple of 128 (or the full spatial extent).
    if HW % 128 == 0:
        tl = min(tl_max, HW)
    elif HW < 128:
        tl = HW
    else:
        tl = min(tl_max, (HW // 128) * 128)   # ragged last block handled by Pallas
    n_tiles = pl.cdiv(HW, tl)

    out = pl.pallas_call(
        functools.partial(_scaler_kernel, c_in=C_in, c_out=C_out),
        out_shape=jax.ShapeDtypeStruct((B, C_out, HW), jnp.float32),
        grid_spec=pltpu.PrefetchScalarGridSpec(
            num_scalar_prefetch=0,
            grid=(B, n_tiles),
            in_specs=[
                pl.BlockSpec(memory_space=pltpu.MemorySpace.SMEM),   # w_folded
                pl.BlockSpec(memory_space=pltpu.MemorySpace.SMEM),   # b_folded
                pl.BlockSpec((None, C_in, tl), lambda b, t: (b, 0, t)),
            ],
            out_specs=pl.BlockSpec((None, C_out, tl), lambda b, t: (b, 0, t)),
        ),
        compiler_params=pltpu.CompilerParams(
            dimension_semantics=("parallel", "parallel"),
        ),
    )(w_folded, b_folded, x)

    # (B, C_out, H*W) -> (B, C_out, H, W): free reshape, already NCHW order.
    return out.reshape(B, C_out, H, W)


if __name__ == "__main__":
    key = jax.random.PRNGKey(0)
    k_x, k_w = jax.random.split(key)

    B, C_in, H, W = 2, 3, 16, 16       # small RGB "images"
    num_classes = 4

    inputs = jax.random.normal(k_x, (B, C_in, H, W), dtype=jnp.float32)

    # Deterministic synthetic parameters (stand-in for the frozen model head)
    weight = jax.random.normal(k_w, (C_in, num_classes), dtype=jnp.float32) * 0.1
    bias = jnp.zeros((num_classes,), dtype=jnp.float32)
    temperature = jnp.array([1.5], dtype=jnp.float32)  # Scaler's learned temperature

    out = scaler_forward(inputs, weight, bias, temperature)
    out = jax.block_until_ready(out)

    # Pure-JAX reference check
    x_flat = jnp.transpose(inputs, (0, 2, 3, 1)).reshape(-1, C_in)
    ref = (x_flat @ weight + bias) / temperature[0]
    ref = jnp.transpose(ref.reshape(B, H, W, num_classes), (0, 3, 1, 2))
    assert out.shape == (B, num_classes, H, W)
    assert jnp.allclose(out, ref, atol=1e-5, rtol=1e-5)

    print("KERNEL_OK")
</pallas_src>

<mosaic_0001>
module attributes {stable_mosaic.version = 11 : i64} {
  func.func @_scaler_kernel(%arg0: i32, %arg1: i32, %arg2: memref<4x3xf32, #tpu.memory_space<smem>>, %arg3: memref<4xf32, #tpu.memory_space<smem>>, %arg4: memref<1x3x256xf32, #tpu.memory_space<vmem>>, %arg5: memref<1x4x256xf32, #tpu.memory_space<vmem>>) attributes {dimension_semantics = [#tpu.dimension_semantics<parallel>, #tpu.dimension_semantics<parallel>], iteration_bounds = array<i64: 2, 1>, scalar_prefetch = 0 : i64, scratch_operands = 0 : i64, tpu.core_type = #tpu.core_type<tc>, window_params = [{transform_indices = @transform_0, window_bounds = array<i64: 4, 3>}, {transform_indices = @transform_1, window_bounds = array<i64: 4>}, {transform_indices = @transform_2, window_bounds = array<i64: 1, 3, 256>}, {transform_indices = @transform_3, window_bounds = array<i64: 1, 4, 256>}]} {
    %c0 = arith.constant 0 : index
    %c0_0 = arith.constant 0 : index
    %c0_1 = arith.constant 0 : index
    %0 = vector.load %arg4[%c0, %c0_0, %c0_1] : memref<1x3x256xf32, #tpu.memory_space<vmem>>, vector<1x3x256xf32>
    %1 = vector.shape_cast %0 : vector<1x3x256xf32> to vector<3x256xf32>
    %2 = vector.extract_strided_slice %1 {offsets = [0, 0], sizes = [1, 256], strides = [1, 1]} : vector<3x256xf32> to vector<1x256xf32>
    %c0_2 = arith.constant 0 : index
    %c0_3 = arith.constant 0 : index
    %3 = memref.load %arg2[%c0_2, %c0_3] : memref<4x3xf32, #tpu.memory_space<smem>>
    %4 = vector.broadcast %3 : f32 to vector<1x256xf32>
    %5 = arith.mulf %2, %4 : vector<1x256xf32>
    %c0_4 = arith.constant 0 : index
    %6 = memref.load %arg3[%c0_4] : memref<4xf32, #tpu.memory_space<smem>>
    %7 = vector.broadcast %6 : f32 to vector<1x256xf32>
    %8 = arith.addf %5, %7 : vector<1x256xf32>
    %9 = vector.extract_strided_slice %1 {offsets = [1, 0], sizes = [1, 256], strides = [1, 1]} : vector<3x256xf32> to vector<1x256xf32>
    %c0_5 = arith.constant 0 : index
    %c1 = arith.constant 1 : index
    %10 = memref.load %arg2[%c0_5, %c1] : memref<4x3xf32, #tpu.memory_space<smem>>
    %11 = vector.broadcast %10 : f32 to vector<1x256xf32>
    %12 = arith.mulf %9, %11 : vector<1x256xf32>
    %13 = arith.addf %8, %12 : vector<1x256xf32>
    %14 = vector.extract_strided_slice %1 {offsets = [2, 0], sizes = [1, 256], strides = [1, 1]} : vector<3x256xf32> to vector<1x256xf32>
    %c0_6 = arith.constant 0 : index
    %c2 = arith.constant 2 : index
    %15 = memref.load %arg2[%c0_6, %c2] : memref<4x3xf32, #tpu.memory_space<smem>>
    %16 = vector.broadcast %15 : f32 to vector<1x256xf32>
    %17 = arith.mulf %14, %16 : vector<1x256xf32>
    %18 = arith.addf %13, %17 : vector<1x256xf32>
    %19 = vector.extract_strided_slice %1 {offsets = [0, 0], sizes = [1, 256], strides = [1, 1]} : vector<3x256xf32> to vector<1x256xf32>
    %c1_7 = arith.constant 1 : index
    %c0_8 = arith.constant 0 : index
    %20 = memref.load %arg2[%c1_7, %c0_8] : memref<4x3xf32, #tpu.memory_space<smem>>
    %21 = vector.broadcast %20 : f32 to vector<1x256xf32>
    %22 = arith.mulf %19, %21 : vector<1x256xf32>
    %c1_9 = arith.constant 1 : index
    %23 = memref.load %arg3[%c1_9] : memref<4xf32, #tpu.memory_space<smem>>
    %24 = vector.broadcast %23 : f32 to vector<1x256xf32>
    %25 = arith.addf %22, %24 : vector<1x256xf32>
    %26 = vector.extract_strided_slice %1 {offsets = [1, 0], sizes = [1, 256], strides = [1, 1]} : vector<3x256xf32> to vector<1x256xf32>
    %c1_10 = arith.constant 1 : index
    %c1_11 = arith.constant 1 : index
    %27 = memref.load %arg2[%c1_10, %c1_11] : memref<4x3xf32, #tpu.memory_space<smem>>
    %28 = vector.broadcast %27 : f32 to vector<1x256xf32>
    %29 = arith.mulf %26, %28 : vector<1x256xf32>
    %30 = arith.addf %25, %29 : vector<1x256xf32>
    %31 = vector.extract_strided_slice %1 {offsets = [2, 0], sizes = [1, 256], strides = [1, 1]} : vector<3x256xf32> to vector<1x256xf32>
    %c1_12 = arith.constant 1 : index
    %c2_13 = arith.constant 2 : index
    %32 = memref.load %arg2[%c1_12, %c2_13] : memref<4x3xf32, #tpu.memory_space<smem>>
    %33 = vector.broadcast %32 : f32 to vector<1x256xf32>
    %34 = arith.mulf %31, %33 : vector<1x256xf32>
    %35 = arith.addf %30, %34 : vector<1x256xf32>
    %36 = vector.extract_strided_slice %1 {offsets = [0, 0], sizes = [1, 256], strides = [1, 1]} : vector<3x256xf32> to vector<1x256xf32>
    %c2_14 = arith.constant 2 : index
    %c0_15 = arith.constant 0 : index
    %37 = memref.load %arg2[%c2_14, %c0_15] : memref<4x3xf32, #tpu.memory_space<smem>>
    %38 = vector.broadcast %37 : f32 to vector<1x256xf32>
    %39 = arith.mulf %36, %38 : vector<1x256xf32>
    %c2_16 = arith.constant 2 : index
    %40 = memref.load %arg3[%c2_16] : memref<4xf32, #tpu.memory_space<smem>>
    %41 = vector.broadcast %40 : f32 to vector<1x256xf32>
    %42 = arith.addf %39, %41 : vector<1x256xf32>
    %43 = vector.extract_strided_slice %1 {offsets = [1, 0], sizes = [1, 256], strides = [1, 1]} : vector<3x256xf32> to vector<1x256xf32>
    %c2_17 = arith.constant 2 : index
    %c1_18 = arith.constant 1 : index
    %44 = memref.load %arg2[%c2_17, %c1_18] : memref<4x3xf32, #tpu.memory_space<smem>>
    %45 = vector.broadcast %44 : f32 to vector<1x256xf32>
    %46 = arith.mulf %43, %45 : vector<1x256xf32>
    %47 = arith.addf %42, %46 : vector<1x256xf32>
    %48 = vector.extract_strided_slice %1 {offsets = [2, 0], sizes = [1, 256], strides = [1, 1]} : vector<3x256xf32> to vector<1x256xf32>
    %c2_19 = arith.constant 2 : index
    %c2_20 = arith.constant 2 : index
    %49 = memref.load %arg2[%c2_19, %c2_20] : memref<4x3xf32, #tpu.memory_space<smem>>
    %50 = vector.broadcast %49 : f32 to vector<1x256xf32>
    %51 = arith.mulf %48, %50 : vector<1x256xf32>
    %52 = arith.addf %47, %51 : vector<1x256xf32>
    %53 = vector.extract_strided_slice %1 {offsets = [0, 0], sizes = [1, 256], strides = [1, 1]} : vector<3x256xf32> to vector<1x256xf32>
    %c3 = arith.constant 3 : index
    %c0_21 = arith.constant 0 : index
    %54 = memref.load %arg2[%c3, %c0_21] : memref<4x3xf32, #tpu.memory_space<smem>>
    %55 = vector.broadcast %54 : f32 to vector<1x256xf32>
    %56 = arith.mulf %53, %55 : vector<1x256xf32>
    %c3_22 = arith.constant 3 : index
    %57 = memref.load %arg3[%c3_22] : memref<4xf32, #tpu.memory_space<smem>>
    %58 = vector.broadcast %57 : f32 to vector<1x256xf32>
    %59 = arith.addf %56, %58 : vector<1x256xf32>
    %60 = vector.extract_strided_slice %1 {offsets = [1, 0], sizes = [1, 256], strides = [1, 1]} : vector<3x256xf32> to vector<1x256xf32>
    %c3_23 = arith.constant 3 : index
    %c1_24 = arith.constant 1 : index
    %61 = memref.load %arg2[%c3_23, %c1_24] : memref<4x3xf32, #tpu.memory_space<smem>>
    %62 = vector.broadcast %61 : f32 to vector<1x256xf32>
    %63 = arith.mulf %60, %62 : vector<1x256xf32>
    %64 = arith.addf %59, %63 : vector<1x256xf32>
    %65 = vector.extract_strided_slice %1 {offsets = [2, 0], sizes = [1, 256], strides = [1, 1]} : vector<3x256xf32> to vector<1x256xf32>
    %c3_25 = arith.constant 3 : index
    %c2_26 = arith.constant 2 : index
    %66 = memref.load %arg2[%c3_25, %c2_26] : memref<4x3xf32, #tpu.memory_space<smem>>
    %67 = vector.broadcast %66 : f32 to vector<1x256xf32>
    %68 = arith.mulf %65, %67 : vector<1x256xf32>
    %69 = arith.addf %64, %68 : vector<1x256xf32>
    %70 = tpu.concatenate %18, %35, %52, %69 in 0 : vector<1x256xf32>, vector<1x256xf32>, vector<1x256xf32>, vector<1x256xf32> -> vector<4x256xf32>
    %c0_27 = arith.constant 0 : index
    %c0_28 = arith.constant 0 : index
    %c0_29 = arith.constant 0 : index
    %71 = vector.load %arg5[%c0_27, %c0_28, %c0_29] : memref<1x4x256xf32, #tpu.memory_space<vmem>>, vector<1x4x256xf32>
    %72 = vector.shape_cast %71 : vector<1x4x256xf32> to vector<4x256xf32>
    %73 = vector.shape_cast %70 : vector<4x256xf32> to vector<1x4x256xf32>
    tpu.vector_store %arg5[%c0_27, %c0_28, %c0_29], %73 {strides = array<i32>} : memref<1x4x256xf32, #tpu.memory_space<vmem>>, vector<1x4x256xf32>,
    return
  }
  func.func @transform_0(%arg0: i32, %arg1: i32) -> (i32, i32) {
    %c0_i32 = arith.constant 0 : i32
    %c0_i32_0 = arith.constant 0 : i32
    %c0_i32_1 = arith.constant 0 : i32
    return %c0_i32, %c0_i32_0 : i32, i32
  }
  func.func @transform_1(%arg0: i32, %arg1: i32) -> i32 {
    %c0_i32 = arith.constant 0 : i32
    %c0_i32_0 = arith.constant 0 : i32
    return %c0_i32 : i32
  }
  func.func @transform_2(%arg0: i32, %arg1: i32) -> (i32, i32, i32) {
    %c0_i32 = arith.constant 0 : i32
    %c0_i32_0 = arith.constant 0 : i32
    return %arg0, %c0_i32, %arg1 : i32, i32, i32
  }
  func.func @transform_3(%arg0: i32, %arg1: i32) -> (i32, i32, i32) {
    %c0_i32 = arith.constant 0 : i32
    %c0_i32_0 = arith.constant 0 : i32
    return %arg0, %c0_i32, %arg1 : i32, i32, i32
  }
}

</mosaic_0001>

<bundles_post_ra>
// kernel: scaler_forward.1
= control target key start
LH: loop header
LB: loop body
LE: loop exit
PB: predicated region body
PF: predicated region fallthrough
CT: control target
= control target key end

     0   :  { %8 = vsyncpa [#allocation3], 0  ;;  %s759_s0 = inlined_call_operand.vmem [shape: f32[4,3], index: 0, kind: input, shape index: {}]   ;;  %s760_s1 = inlined_call_operand.vmem [shape: f32[4], index: 1, kind: input, shape index: {}]   ;;  %s761_s2 = inlined_call_operand.vmem [shape: f32[2,3,256], index: 2, kind: input, shape index: {}]   ;;  %s762_s3 = inlined_call_operand.vmem [shape: f32[2,4,256], index: 3, kind: output, shape index: {}]  }
   0x1   :  { %9 = vsyncpa [#allocation5], 0  ;;  %s661_s12 = smov 0   ;;  %s663_s13 = smov 0  }
   0x2   :  { %s665_s14 = smov 0  }
   0x3 LB: > { %s493_s15 = sadd.s32 4294967295, %s637_s14   ;;  %s27_s16 = sadd.s32 1, %s633_s13  ;;  %s637_s14 = sphi %s665_s14, %s15_s14   ;;  %s633_s13 = sphi %s663_s13, %s772_s13   ;;  %s629_s12 = sphi %s661_s12, %s771_s12  }
   0x4   : > { %p29_p0 = scmp.ge.s32.totalorder %s27_s16, 2  ;;  %p495_p1 = scmp.ge.s32.totalorder %s637_s14, 1 }
   0x5   : > { %p130_p2 = scmp.lt.s32.totalorder %s637_s14, 3  ;;  %p686_p4 = scmp.eq.s32.totalorder %s493_s15, 0 }
   0x6   : > { %s774_s16 = smov (%p29_p0, %s27_s16), 0  ;;  %s143_s21 = sshll.u32 %s759_s0, 4  ;;  %s144_s21 = int_to_ptr.vmem [resolvable:$true] %s143_s21 }
   0x7   : > { %p682_p3 = pnand %p495_p1, %p130_p2  ;;  %s154_s24 = sshll.u32 %s760_s1, 4  ;;  %s155_s24 = int_to_ptr.vmem [resolvable:$true] %s154_s24 }
   0x8   : > { %s767_s18 = scalar_select %p686_p4, 1, 0 }
   0x9   : > { %s766_s17 = scalar_select %p682_p3, 1, 0 }
   0xa   : > { %p540_p5 = pneg %p682_p3  ;;  %s577_s26 = scalar_lea.vmem %s144_s21, 64 }
   0xb   : > { %p578_p7 = scmp.ne.s32.totalorder %s144_s21, %s577_s26  ;;  %p585_p11 = scmp.lt.s32.totalorder %s144_s21, %s144_s21 }
   0xc   : > { %p700_p6 = pnand %p686_p4, %p540_p5  ;;  %p586_p12 = scmp.lt.s32.totalorder %s577_s26, %s577_s26 }
   0xe   : > { %p579_p8 = pneg %p700_p6  ;;  %p587_p13 = por %p586_p12, %p585_p11 }
  0x10   : > { %p580_p9 = pnand %p579_p8, %p578_p7 }
  0x12   : > { %p581_p10 = pneg %p580_p9 }
  0x14   : > { %p588_p0 = pnand %p587_p13, %p581_p10 }
  0x16   : > { %591 = shalt.err (!%p588_p0)
}
  0x17   : > { %s639_s27 = smov [#allocation2]   ;;  %s592_s28 = scalar_lea.vmem %s155_s24, 16 }
  0x18   : > { %543 = dma.vmem_to_smem (!%p700_p6), %s144_s21, 64, %s639_s27, [#allocation3]  }
  0x19   : > { %p593_p1 = scmp.ne.s32.totalorder %s155_s24, %s592_s28  ;;  %p600_p4 = scmp.lt.s32.totalorder %s155_s24, %s155_s24 }
  0x1a   : > { %p601_p3 = scmp.lt.s32.totalorder %s592_s28, %s592_s28 }
  0x1b   : > { %p595_p2 = pnand %p593_p1, %p579_p8 }
  0x1c   : > { %p602_p7 = por %p601_p3, %p600_p4 }
  0x1d   : > { %p596_p5 = pneg %p595_p2 }
  0x1f   : > { %p603_p9 = pnand %p602_p7, %p596_p5 }
  0x21   : > { %606 = shalt.err (!%p603_p9)
}
  0x22   : > { %s640_s29 = smov [#allocation4]   ;;  %p769_p10 = scmp.ne.s32.totalorder %s766_s17, 0 }
  0x23   : > { %546 = dma.vmem_to_smem (!%p700_p6), %s155_s24, 16, %s640_s29, [#allocation5]  }
  0x24   : > { %180 = sbr.rel (%p769_p10) target bundleno = 80 (0x50), region = 32  ;;  %p770_p11 = scmp.ne.s32.totalorder (!%p769_p10), %s767_s18, 0 }
  0x2b   : > { %620 = dma.done.wait (%p770_p11), [#allocation3], 64  }
  0x2c   : > { %622 = vsyncadd (%p770_p11), [#allocation3], 4294967232 }
  0x2d   : > { %624 = dma.done.wait (%p770_p11), [#allocation5], 16  }
  0x2e   : > { %626 = vsyncadd (%p770_p11), [#allocation5], 4294967280 }
  0x2f   : > { %190 = sfence }
  0x30   : > { %p218_p3 = scmp.lt.s32.totalorder %s629_s12, 1  ;;  %s238_s30 = sld [smem:[#allocation2]]  ;;  %v327_v0 = vlaneseq  ;;  %vm370_vm0 = vcmask 1040384   ;;  %vm373_vm1 = vcmask 1041408   ;;  %vm376_vm2 = vcmask 1042432  }
  0x31   : > { %s241_s4 = sld [smem:[#allocation4]]  ;;  %s506_s5 = sld [smem:[#allocation2 + $0x1]] }
  0x32   : > { %s776_s12 = smov (!%p218_p3, %s629_s12), 1  ;;  %s508_s6 = sld [smem:[#allocation2 + $0x2]]  ;;  %v328_v6 = vshrl.u32 %v327_v0, 7 }
  0x33   : > { %s510_s7 = sld [smem:[#allocation2 + $0x80]]  ;;  %s530_s8 = sshll.u32 %s776_s12, 3 }
  0x34   : > { %s511_s9 = sld [smem:[#allocation4 + $0x1]]  ;;  %s225_s15 = scalar_lea.vmem %s761_s2, %s530_s8  ;;  %v329_v15 = vsub.s32 0, %v328_v6  ;;  %v333_v16 = vsub.s32 4, %v328_v6 }
  0x35   : > { %v237_v1 = vld [vmem:[%s225_s15] sm:$0x77]  ;;  %s512_s17 = sld [smem:[#allocation2 + $0x81]]  ;;  %s730_s18 = sld [smem:[#allocation2 + $0x82]] }
  0x36   : > { %v239_v2 = vstv %s238_s30  ;;  %s516_s19 = sld [smem:[#allocation2 + $0x100]]  ;;  %s732_s20 = sld [smem:[#allocation4 + $0x2]] }
  0x37   : > { %v240_v3 = vmul.f32 %v239_v2, %v237_v1  ;;  %v242_v4 = vstv %s241_s4  ;;  %v245_v5 = vstv %s506_s5  ;;  %s518_s21 = sld [smem:[#allocation2 + $0x101]]  ;;  %s734_s22 = sld [smem:[#allocation2 + $0x102]] }
  0x38   : > { %v246_v7 = vmul.f32 %v245_v5, %v237_v1  ;;  %v253_v9 = vstv %s508_s6  ;;  %s522_s23 = sld [smem:[#allocation2 + $0x180]]  ;;  %s736_s24 = sld [smem:[#allocation4 + $0x3]] }
  0x39   : > { %v243_v8 = vadd.f32 %v242_v4, %v240_v3  ;;  %v261_v10 = vstv %s510_s7  ;;  %v254_v12 = vmul.f32 %v253_v9, %v237_v1  ;;  %s524_s25 = sld [smem:[#allocation2 + $0x181]]  ;;  %s738_s26 = sld [smem:[#allocation2 + $0x182]] }
  0x3a   : > { %v507_v11 = vrot.slane %v246_v7, 9  ;;  %v262_v13 = vmul.f32 %v261_v10, %v237_v1  ;;  %v264_v14 = vstv %s511_s9  ;;  %s235_s29 = scalar_lea.vmem %s762_s3, %s530_s8 }
  0x3b   : > { %v509_v18 = vrot.slane %v254_v12, 10  ;;  %v267_v20 = vstv %s512_s17  ;;  %v275_v22 = vstv %s730_s18 }
  0x3c   : > { %v251_v17 = vadd.f32 %v507_v11, %v243_v8  ;;  %v265_v19 = vadd.f32 %v264_v14, %v262_v13  ;;  %v268_v21 = vmul.f32 %v267_v20, %v237_v1  ;;  %v283_v23 = vstv %s516_s19 }
  0x3d   : > { %v286_v24 = vstv %s732_s20  ;;  %v276_v26 = vmul.f32 %v275_v22, %v237_v1  ;;  %v284_v27 = vmul.f32 %v283_v23, %v237_v1  ;;  %v289_v28 = vstv %s518_s21 }
  0x3e   : > { %v259_v25 = vadd.f32 %v509_v18, %v251_v17  ;;  %v513_v29 = vrot.slane %v268_v21, 9  ;;  %v290_v30 = vmul.f32 %v289_v28, %v237_v1  ;;  %v297_v31 = vstv %s734_s22 }
  0x3f   : > { %v305_v32 = vstv %s522_s23  ;;  %v515_v33 = vrot.slane %v276_v26, 10  ;;  %v287_v34 = vadd.f32 %v286_v24, %v284_v27  ;;  %v298_v35 = vmul.f32 %v297_v31, %v237_v1 }
  0x40   : > { %v306_v36 = vmul.f32 %v305_v32, %v237_v1  ;;  %v273_v37 = vadd.f32 %v513_v29, %v265_v19  ;;  %v519_v38 = vrot.slane %v290_v30, 9  ;;  %v308_v39 = vstv %s736_s24 }
  0x41   : > { %v311_v40 = vstv %s524_s25  ;;  %v521_v41 = vrot.slane %v298_v35, 10  ;;  %v319_v44 = vstv %s738_s26  ;;  %v330_v48 = vrot.slane %v259_v25, %v329_v15 }
  0x42   : > { %v309_v42 = vadd.f32 %v308_v39, %v306_v36  ;;  %v312_v43 = vmul.f32 %v311_v40, %v237_v1  ;;  %v281_v45 = vadd.f32 %v515_v33, %v273_v37  ;;  %v295_v46 = vadd.f32 %v519_v38, %v287_v34 }
  0x43   : > { %v320_v47 = vmul.f32 %v319_v44, %v237_v1  ;;  %v334_v50 = vrot.slane %v259_v25, %v333_v16 }
  0x44   : > { %v525_v49 = vrot.slane %v312_v43, 9  ;;  %v303_v51 = vadd.f32 %v521_v41, %v295_v46  ;;  %v341_v53 = vrot.slane %v281_v45, %v329_v15  ;;  %v345_v54 = vrot.slane %v281_v45, %v333_v16 }
  0x45   : > { %v527_v52 = vrot.slane %v320_v47, 10 }
  0x46   : > { %v317_v55 = vadd.f32 %v525_v49, %v309_v42  ;;  %v352_v56 = vrot.slane %v303_v51, %v329_v15  ;;  %v356_v57 = vrot.slane %v303_v51, %v333_v16  ;;  %v371_v58 = vsel %vm370_vm0, %v330_v48, %v341_v53 }
  0x47   : > { %v372_v59 = vsel %vm370_vm0, %v334_v50, %v345_v54 }
  0x48   : > { %v325_v60 = vadd.f32 %v527_v52, %v317_v55  ;;  %v374_v61 = vsel %vm373_vm1, %v371_v58, %v352_v56  ;;  %v375_v62 = vsel %vm373_vm1, %v372_v59, %v356_v57 }
  0x4a   : > { %v363_v63 = vrot.slane %v325_v60, %v329_v15  ;;  %v367_v0 = vrot.slane %v325_v60, %v333_v16 }
  0x4c   : > { %v377_v1 = vsel %vm376_vm2, %v374_v61, %v363_v63  ;;  %v378_v2 = vsel %vm376_vm2, %v375_v62, %v367_v0 }
  0x4d   : > { %v381_v3 = vcombine.low %v377_v1, %v378_v2 }
  0x4f   : > { %383 = vst [vmem:[%s235_s29] sm:$0xff] %v381_v3 }
  0x50 PF: > { %s15_s14 = sadd.s32 1, %s637_s14   ;;  %s771_s12 = smov %s633_s13 }
  0x51   : > { %p12_p4 = scmp.ge.s32.totalorder %s15_s14, 4   ;;  %s772_s13 = smov %s774_s16 }
  0x53   :  { %14 = sbr.rel (!%p12_p4) target bundleno = 3 (0x3), region = 71 }
  0x5a   :  { %414 = vsyncpa [#allocation3], 1 }
  0x5b   :  { %416 = vsyncpa [#allocation3 + $0x1], 1 }
  0x5c   :  { %417 = vsyncpa [#allocation5], 1 }

</bundles_post_ra>
